<compile_context>
chip_gen: v6e
topology: v6e:2x2x1
jax: 0.10.0
libtpu: 0.0.40
codegen_flags: <defaults>
</compile_context>

<pallas_src>
import jax
import jax.numpy as jnp
from jax.experimental import pallas as pl
from jax.experimental.pallas import tpu as pltpu

_LANES = 128


def _make_argmax_kernel(vocab_size: int, v_tile: int, needs_v_mask: bool):
    def kernel(x_ref, o_ref, max_sc, idx_sc):
        v_i = pl.program_id(1)
        row_tile = x_ref.shape[0]

        @pl.when(v_i == 0)
        def _init():
            max_sc[...] = jnp.full(max_sc.shape, -jnp.inf, dtype=max_sc.dtype)
            idx_sc[...] = jnp.zeros(idx_sc.shape, dtype=idx_sc.dtype)

        vals = x_ref[...].astype(jnp.float32)                 # (TR, TV)
        # NaN handling: treat NaN as +inf -> a NaN row returns its first NaN's
        # index (torch.argmax / np.argmax behavior for the common case).
        vals = jnp.where(jnp.isnan(vals), jnp.inf, vals)

        lane = jax.lax.broadcasted_iota(jnp.int32, vals.shape, 1)
        if needs_v_mask:
            # Last vocab block may extend past V: mask out-of-range lanes.
            valid = (lane + v_i * v_tile) < vocab_size
            vals = jnp.where(valid, vals, -jnp.inf)

        tile_max = jnp.max(vals, axis=-1, keepdims=True)      # (TR, 1)
        # First occurrence of the tile max (torch.argmax tie rule).
        in_tile_arg = jnp.min(
            jnp.where(vals == tile_max, lane, jnp.int32(v_tile)),
            axis=-1, keepdims=True)                           # (TR, 1) int32
        tile_arg = in_tile_arg + v_i * v_tile

        # Strict '>' keeps the earliest vocab block on cross-block ties.
        better = tile_max > max_sc[...]
        idx_sc[...] = jnp.where(better, tile_arg, idx_sc[...])
        max_sc[...] = jnp.where(better, tile_max, max_sc[...])

        @pl.when(v_i == pl.num_programs(1) - 1)
        def _finalize():
            # Lane-dense store: turn the (TR, 1) index column into a (1, TR)
            # row (lane-replicate, 32-bit XLU transpose, take row 0). The
            # compute hides under the much larger input DMA.
            rep = jnp.broadcast_to(idx_sc[...], (row_tile, _LANES))
            o_ref[0] = jnp.transpose(rep, (1, 0))[0:1, :]

    return kernel


def _choose_tiles(rows: int, vocab: int, itemsize: int):
    # Vocab tile: whole vocab when modest, else a lane-aligned slab. V-tiling
    # keeps the row tile large even for huge wordpiece vocabularies.
    max_v_tile = 4096 if itemsize <= 2 else 2048
    v_tile = vocab if vocab <= max_v_tile else max_v_tile

    # Row tile: target ~4 MiB per input block; with double-buffering that is
    # ~8 MiB of VMEM -- comfortably inside every generation, incl. v7x (64 MiB).
    target_block_bytes = 4 * 1024 * 1024
    rt = target_block_bytes // max(1, v_tile * itemsize)
    rt = max(_LANES, min(1024, (rt // _LANES) * _LANES))

    # Keep several row blocks so the "parallel" row axis can be split across
    # TensorCores (v7x has 2 TCs per chip).
    rt_cap = ((pl.cdiv(rows, 8) + _LANES - 1) // _LANES) * _LANES
    rt = max(_LANES, min(rt, rt_cap))
    return rt, v_tile


def greedy_argmax(emission: jax.Array, *, row_tile=None, vocab_tile=None) -> jax.Array:
    """emission: [B, T, V] float (f32/bf16) -> [B, T] int32 argmax over V."""
    B, T, V = emission.shape
    rows = B * T
    itemsize = jnp.dtype(emission.dtype).itemsize

    rt, vt = _choose_tiles(rows, V, itemsize)
    if row_tile is not None:
        rt = int(row_tile)
    if vocab_tile is not None:
        vt = int(vocab_tile)
    assert rt % _LANES == 0, "row tile must be a multiple of 128 (lane-dense out)"
    assert vt == V or vt % _LANES == 0, "vocab tile must be 128-aligned or == V"

    x2d = emission.reshape(rows, V)                 # free: contiguity preserved
    if rows < rt:
        # Tiny inputs: pad rows so the single row block is fully in-bounds.
        x2d = jnp.pad(x2d, ((0, rt - rows), (0, 0)))
    padded_rows = x2d.shape[0]

    n_row_blocks = pl.cdiv(padded_rows, rt)
    n_v_blocks = pl.cdiv(V, vt)
    needs_v_mask = (n_v_blocks * vt) != V

    kernel = _make_argmax_kernel(V, vt, needs_v_mask)

    in_block_bytes = rt * vt * itemsize
    vmem_limit = min(int(56 * 2**20), max(int(32 * 2**20), 4 * in_block_bytes))

    out = pl.pallas_call(
        kernel,
        out_shape=jax.ShapeDtypeStruct((n_row_blocks, 1, rt), jnp.int32),
        grid_spec=pltpu.PrefetchScalarGridSpec(
            num_scalar_prefetch=0,
            grid=(n_row_blocks, n_v_blocks),           # vocab (reduction) last
            in_specs=[pl.BlockSpec((rt, vt), lambda r, v: (r, v))],
            out_specs=pl.BlockSpec((1, 1, rt), lambda r, v: (r, 0, 0)),
            scratch_shapes=[
                pltpu.VMEM((rt, 1), jnp.float32),      # running max
                pltpu.VMEM((rt, 1), jnp.int32),        # running argmax
            ],
        ),
        compiler_params=pltpu.CompilerParams(
            dimension_semantics=("parallel", "arbitrary"),
            vmem_limit_bytes=vmem_limit,
        ),
    )(x2d)

    # Rows beyond B*T (row padding / ragged last row block) are garbage: drop.
    return out.reshape(-1)[:rows].reshape(B, T)


class GreedyCTCDecoderPallas:
    """JAX/Pallas port of GreedyCTCDecoder. The argmax hot path runs on TPU."""

    def __init__(self, tokenizer, blank: int):
        self.tokenizer = tokenizer
        self.blank = blank

    def forward(self, emission: jax.Array) -> list:
        indices = jax.device_get(greedy_argmax(emission))    # [B, T] int32
        # TODO(synk): tokenizer.decode_batch is a host-side string op; a
        # synthetic tokenizer is used here (no vocab file / checkpoint loaded).
        decoded = self.tokenizer.decode_batch(indices)
        return [item.replace(" ##", "") for item in decoded]

    def decode_text(self, real_text: jax.Array) -> list:
        indices = jax.device_get(real_text)
        decoded = self.tokenizer.decode_batch(indices)
        return [item.replace(" ##", "") for item in decoded]


class _SyntheticTokenizer:
    """Deterministic stand-in tokenizer: index -> letter, blank skipped."""

    def __init__(self, vocab_size: int, blank: int):
        self.blank = blank
        self.vocab = [chr(ord("a") + (i % 26)) for i in range(vocab_size)]

    def decode_batch(self, batch_indices) -> list:
        out = []
        for row in batch_indices:
            toks = [self.vocab[int(i)] for i in row if int(i) != self.blank]
            out.append(" ".join(toks))
        return out


if __name__ == "__main__":
    # Small shapes consistent with forward(): emission [batch, num_seq, num_label]
    B, T, V = 2, 8, 32
    key = jax.random.PRNGKey(0)
    emission = jax.random.normal(key, (B, T, V), dtype=jnp.float32)

    # f32 path
    idx = jax.block_until_ready(greedy_argmax(emission))
    ref = jnp.argmax(emission, axis=-1).astype(jnp.int32)
    assert bool(jnp.all(idx == ref)), "Pallas argmax (f32) mismatch vs reference"

    # bf16 path (half the HBM read traffic; compared in f32 inside the kernel)
    em_bf16 = emission.astype(jnp.bfloat16)
    idx_bf = jax.block_until_ready(greedy_argmax(em_bf16))
    ref_bf = jnp.argmax(em_bf16, axis=-1).astype(jnp.int32)
    assert bool(jnp.all(idx_bf == ref_bf)), "Pallas argmax (bf16) mismatch"

    # Exercise vocab tiling (masked tail block) + ragged row blocks.
    B2, T2, V2 = 2, 200, 200
    em2 = jax.random.normal(jax.random.PRNGKey(1), (B2, T2, V2), jnp.float32)
    idx2 = jax.block_until_ready(greedy_argmax(em2, vocab_tile=128))
    ref2 = jnp.argmax(em2, axis=-1).astype(jnp.int32)
    assert bool(jnp.all(idx2 == ref2)), "Pallas argmax (tiled vocab) mismatch"

    # Full forward path with the synthetic tokenizer (host-side glue).
    decoder = GreedyCTCDecoderPallas(_SyntheticTokenizer(V, blank=0), blank=0)
    transcripts = decoder.forward(emission)
    assert len(transcripts) == B

    print("KERNEL_OK")
</pallas_src>

<mosaic_0001>
module attributes {stable_mosaic.version = 11 : i64} {
  func.func @kernel(%arg0: i32, %arg1: i32, %arg2: memref<128x32xf32, #tpu.memory_space<vmem>>, %arg3: memref<1x1x128xi32, #tpu.memory_space<vmem>>, %arg4: memref<128x1xf32, #tpu.memory_space<vmem>>, %arg5: memref<128x1xi32, #tpu.memory_space<vmem>>) attributes {dimension_semantics = [#tpu.dimension_semantics<parallel>, #tpu.dimension_semantics<arbitrary>], iteration_bounds = array<i64: 1, 1>, scalar_prefetch = 0 : i64, scratch_operands = 2 : i64, tpu.core_type = #tpu.core_type<tc>, window_params = [{transform_indices = @transform_0, window_bounds = array<i64: 128, 32>}, {transform_indices = @transform_1, window_bounds = array<i64: 1, 1, 128>}]} {
    %c0_i32 = arith.constant 0 : i32
    %0 = arith.cmpi eq, %arg1, %c0_i32 : i32
    %1 = arith.extui %0 : i1 to i32
    %c0_i32_0 = arith.constant 0 : i32
    %2 = arith.cmpi ne, %1, %c0_i32_0 : i32
    scf.if %2 {
      %cst_17 = arith.constant 0xFF800000 : f32
      %30 = vector.broadcast %cst_17 : f32 to vector<128x1xf32>
      %c0_18 = arith.constant 0 : index
      %c0_19 = arith.constant 0 : index
      %31 = vector.load %arg4[%c0_18, %c0_19] : memref<128x1xf32, #tpu.memory_space<vmem>>, vector<128x1xf32>
      tpu.vector_store %arg4[%c0_18, %c0_19], %30 {strides = array<i32>} : memref<128x1xf32, #tpu.memory_space<vmem>>, vector<128x1xf32>,
      %c0_i32_20 = arith.constant 0 : i32
      %32 = vector.broadcast %c0_i32_20 : i32 to vector<128x1xi32>
      %c0_21 = arith.constant 0 : index
      %c0_22 = arith.constant 0 : index
      %33 = vector.load %arg5[%c0_21, %c0_22] : memref<128x1xi32, #tpu.memory_space<vmem>>, vector<128x1xi32>
      tpu.vector_store %arg5[%c0_21, %c0_22], %32 {strides = array<i32>} : memref<128x1xi32, #tpu.memory_space<vmem>>, vector<128x1xi32>,
    } else {
    }
    %c0 = arith.constant 0 : index
    %c0_1 = arith.constant 0 : index
    %3 = vector.load %arg2[%c0, %c0_1] : memref<128x32xf32, #tpu.memory_space<vmem>>, vector<128x32xf32>
    %4 = arith.cmpf one, %3, %3 : vector<128x32xf32>
    %cst = arith.constant 0x7F800000 : f32
    %5 = vector.broadcast %cst : f32 to vector<128x32xf32>
    %6 = arith.select %4, %5, %3 : vector<128x32xi1>, vector<128x32xf32>
    %7 = tpu.iota {dimensions = array<i32: 1>} : vector<128x32xi32>
    %cst_2 = arith.constant dense<0xFF800000> : vector<128xf32>
    %8 = vector.multi_reduction <maximumf>, %6, %cst_2 [1] : vector<128x32xf32> to vector<128xf32>
    %9 = vector.shape_cast %8 : vector<128xf32> to vector<128x1xf32>
    %10 = vector.broadcast %9 : vector<128x1xf32> to vector<128x32xf32>
    %11 = arith.cmpf oeq, %6, %10 : vector<128x32xf32>
    %c32_i32 = arith.constant 32 : i32
    %12 = vector.broadcast %c32_i32 : i32 to vector<128x32xi32>
    %13 = arith.select %11, %7, %12 : vector<128x32xi1>, vector<128x32xi32>
    %cst_3 = arith.constant dense<2147483647> : vector<128xi32>
    %14 = vector.multi_reduction <minsi>, %13, %cst_3 [1] : vector<128x32xi32> to vector<128xi32>
    %15 = vector.shape_cast %14 : vector<128xi32> to vector<128x1xi32>
    %c32_i32_4 = arith.constant 32 : i32
    %16 = arith.muli %arg1, %c32_i32_4 : i32
    %17 = vector.broadcast %16 : i32 to vector<128x1xi32>
    %18 = arith.addi %15, %17 : vector<128x1xi32>
    %c0_5 = arith.constant 0 : index
    %c0_6 = arith.constant 0 : index
    %19 = vector.load %arg4[%c0_5, %c0_6] : memref<128x1xf32, #tpu.memory_space<vmem>>, vector<128x1xf32>
    %20 = arith.cmpf ogt, %9, %19 : vector<128x1xf32>
    %c0_7 = arith.constant 0 : index
    %c0_8 = arith.constant 0 : index
    %21 = vector.load %arg5[%c0_7, %c0_8] : memref<128x1xi32, #tpu.memory_space<vmem>>, vector<128x1xi32>
    %22 = arith.select %20, %18, %21 : vector<128x1xi1>, vector<128x1xi32>
    %c0_9 = arith.constant 0 : index
    %c0_10 = arith.constant 0 : index
    %23 = vector.load %arg5[%c0_9, %c0_10] : memref<128x1xi32, #tpu.memory_space<vmem>>, vector<128x1xi32>
    tpu.vector_store %arg5[%c0_9, %c0_10], %22 {strides = array<i32>} : memref<128x1xi32, #tpu.memory_space<vmem>>, vector<128x1xi32>,
    %c0_11 = arith.constant 0 : index
    %c0_12 = arith.constant 0 : index
    %24 = vector.load %arg4[%c0_11, %c0_12] : memref<128x1xf32, #tpu.memory_space<vmem>>, vector<128x1xf32>
    %25 = arith.select %20, %9, %24 : vector<128x1xi1>, vector<128x1xf32>
    %c0_13 = arith.constant 0 : index
    %c0_14 = arith.constant 0 : index
    %26 = vector.load %arg4[%c0_13, %c0_14] : memref<128x1xf32, #tpu.memory_space<vmem>>, vector<128x1xf32>
    tpu.vector_store %arg4[%c0_13, %c0_14], %25 {strides = array<i32>} : memref<128x1xf32, #tpu.memory_space<vmem>>, vector<128x1xf32>,
    %c0_i32_15 = arith.constant 0 : i32
    %27 = arith.cmpi eq, %arg1, %c0_i32_15 : i32
    %28 = arith.extui %27 : i1 to i32
    %c0_i32_16 = arith.constant 0 : i32
    %29 = arith.cmpi ne, %28, %c0_i32_16 : i32
    scf.if %29 {
      %c0_17 = arith.constant 0 : index
      %c0_18 = arith.constant 0 : index
      %30 = vector.load %arg5[%c0_17, %c0_18] : memref<128x1xi32, #tpu.memory_space<vmem>>, vector<128x1xi32>
      %31 = vector.shape_cast %30 : vector<128x1xi32> to vector<128x1xi32>
      %32 = vector.broadcast %31 : vector<128x1xi32> to vector<128x128xi32>
      %33 = tpu.transpose %32, [1, 0] : vector<128x128xi32> -> vector<128x128xi32>
      %34 = vector.extract_strided_slice %33 {offsets = [0, 0], sizes = [1, 128], strides = [1, 1]} : vector<128x128xi32> to vector<1x128xi32>
      %c0_19 = arith.constant 0 : index
      %c0_20 = arith.constant 0 : index
      %c0_21 = arith.constant 0 : index
      %35 = vector.load %arg3[%c0_19, %c0_20, %c0_21] : memref<1x1x128xi32, #tpu.memory_space<vmem>>, vector<1x1x128xi32>
      %36 = vector.shape_cast %35 : vector<1x1x128xi32> to vector<1x128xi32>
      %37 = vector.shape_cast %34 : vector<1x128xi32> to vector<1x1x128xi32>
      tpu.vector_store %arg3[%c0_19, %c0_20, %c0_21], %37 {strides = array<i32>} : memref<1x1x128xi32, #tpu.memory_space<vmem>>, vector<1x1x128xi32>,
    } else {
    }
    return
  }
  func.func @transform_0(%arg0: i32, %arg1: i32) -> (i32, i32) {
    %c0_i32 = arith.constant 0 : i32
    return %arg0, %arg1 : i32, i32
  }
  func.func @transform_1(%arg0: i32, %arg1: i32) -> (i32, i32, i32) {
    %c0_i32 = arith.constant 0 : i32
    %c0_i32_0 = arith.constant 0 : i32
    %c0_i32_1 = arith.constant 0 : i32
    return %arg0, %c0_i32, %c0_i32_0 : i32, i32, i32
  }
}

</mosaic_0001>

<bundles_post_ra>
// kernel: tpu_custom_call.1
= control target key start
LH: loop header
LB: loop body
LE: loop exit
PB: predicated region body
PF: predicated region fallthrough
CT: control target
= control target key end

     0   :  { %vm96_vm0 = vcmask 261120   ;;  %s1379_s0 = inlined_call_operand.vmem [shape: f32[128,32], index: 0, kind: input, shape index: {}]   ;;  %s1380_s1 = inlined_call_operand.hbm [shape: s32[1,1,128], index: 1, kind: output, shape index: {}]  }
   0x1   :  { %v46_v0 = vld [vmem:[%s1379_s0] sm:$0xff]  ;;  %v48_v1 = vld [vmem:[%s1379_s0 + $0x10] sm:$0xff]  ;;  %v47_v2 = vld [vmem:[%s1379_s0 + $0x8] sm:$0xff] }
   0x2   :  { %vm62_vm1 = vcmp.ne.f32.partialorder %v46_v0, %v46_v0  ;;  %vm64_vm2 = vcmp.ne.f32.partialorder %v48_v1, %v48_v1  ;;  %vm63_vm3 = vcmp.ne.f32.partialorder %v47_v2, %v47_v2  ;;  %v49_v3 = vld [vmem:[%s1379_s0 + $0x18] sm:$0xff]  ;;  %v50_v4 = vld [vmem:[%s1379_s0 + $0x20] sm:$0xff]  ;;  %v51_v5 = vld [vmem:[%s1379_s0 + $0x28] sm:$0xff] }
   0x3   :  { %v736_v6 = vsel %vm62_vm1, inf, %v46_v0  ;;  %v738_v7 = vsel %vm64_vm2, inf, %v48_v1  ;;  %v740_v8 = vsel %vm63_vm3, inf, %v47_v2  ;;  %vm65_vm4 = vcmp.ne.f32.partialorder %v49_v3, %v49_v3  ;;  %v52_v12 = vld [vmem:[%s1379_s0 + $0x30] sm:$0xff]  ;;  %v53_v13 = vld [vmem:[%s1379_s0 + $0x38] sm:$0xff] }
   0x4   :  { %v97_v9 = vsel %vm96_vm0, %v736_v6, -inf  ;;  %v103_v10 = vsel %vm96_vm0, %v738_v7, -inf  ;;  %v746_v11 = vsel %vm65_vm4, inf, %v49_v3  ;;  %vm66_vm5 = vcmp.ne.f32.partialorder %v50_v4, %v50_v4 }
   0x5   :  { %98 = vmax.xlane.f32.xlu0 %v97_v9  ;;  %104 = vmax.xlane.f32.xlu1 %v103_v10  ;;  %vm67_vm6 = vcmp.ne.f32.partialorder %v51_v5, %v51_v5  ;;  %v100_v14 = vsel %vm96_vm0, %v740_v8, -inf  ;;  %v106_v15 = vsel %vm96_vm0, %v746_v11, -inf  ;;  %v758_v16 = vsel %vm66_vm5, inf, %v50_v4 }
   0x6   :  { %v760_v17 = vsel %vm67_vm6, inf, %v51_v5 }
   0x7   :  { %6 = vsyncpa [#allocation5], 0  ;;  %vm68_vm7 = vcmp.ne.f32.partialorder %v52_v12, %v52_v12  ;;  %vm69_vm8 = vcmp.ne.f32.partialorder %v53_v13, %v53_v13  ;;  %v54_v18 = vld [vmem:[%s1379_s0 + $0x40] sm:$0xff]  ;;  %v55_v19 = vld [vmem:[%s1379_s0 + $0x48] sm:$0xff]  ;;  %v109_v20 = vsel %vm96_vm0, %v758_v16, -inf  ;;  %v112_v21 = vsel %vm96_vm0, %v760_v17, -inf }
   0x8   :  { %v772_v22 = vsel %vm68_vm7, inf, %v52_v12  ;;  %v774_v23 = vsel %vm69_vm8, inf, %v53_v13  ;;  %vm70_vm9 = vcmp.ne.f32.partialorder %v54_v18, %v54_v18  ;;  %vm71_vm10 = vcmp.ne.f32.partialorder %v55_v19, %v55_v19  ;;  %v56_v24 = vld [vmem:[%s1379_s0 + $0x50] sm:$0xff]  ;;  %v57_v25 = vld [vmem:[%s1379_s0 + $0x58] sm:$0xff]  ;;  %v58_v31 = vld [vmem:[%s1379_s0 + $0x60] sm:$0xff] }
   0x9   :  { %101 = vmax.xlane.f32.xlu0 %v100_v14  ;;  %107 = vmax.xlane.f32.xlu1 %v106_v15  ;;  %v115_v26 = vsel %vm96_vm0, %v772_v22, -inf  ;;  %v118_v27 = vsel %vm96_vm0, %v774_v23, -inf  ;;  %vm13_vm11 = vcmask 7168   ;;  %v786_v28 = vsel %vm70_vm9, inf, %v54_v18  ;;  %v59_v32 = vld [vmem:[%s1379_s0 + $0x68] sm:$0xff]  ;;  %v60_v37 = vld [vmem:[%s1379_s0 + $0x70] sm:$0xff] }
   0xa   :  { %v788_v29 = vsel %vm71_vm10, inf, %v55_v19  ;;  %v705_v30 = vmov -inf   ;;  %vm72_vm12 = vcmp.ne.f32.partialorder %v56_v24, %v56_v24  ;;  %vm73_vm13 = vcmp.ne.f32.partialorder %v57_v25, %v57_v25  ;;  %v61_v38 = vld [vmem:[%s1379_s0 + $0x78] sm:$0xff]  ;;  %s707_s0 = smov [#allocation4]  }
   0xb   :  { %14 = vst.msk [vmem:[#allocation2] sm:$0xff] %vm13_vm11, %v705_v30  ;;  %15 = vst.msk [vmem:[#allocation2 + $0x8] sm:$0xff] %vm13_vm11, %v705_v30  ;;  %v121_v33 = vsel %vm96_vm0, %v786_v28, -inf  ;;  %v124_v34 = vsel %vm96_vm0, %v788_v29, -inf  ;;  %v816_v35 = vsel %vm72_vm12, inf, %v56_v24  ;;  %v818_v36 = vsel %vm73_vm13, inf, %v57_v25 }
   0xc   :  { %16 = vst.msk [vmem:[#allocation2 + $0x10] sm:$0xff] %vm13_vm11, %v705_v30  ;;  %17 = vst.msk [vmem:[#allocation2 + $0x18] sm:$0xff] %vm13_vm11, %v705_v30  ;;  %vm74_vm14 = vcmp.ne.f32.partialorder %v58_v31, %v58_v31  ;;  %vm75_vm15 = vcmp.ne.f32.partialorder %v59_v32, %v59_v32  ;;  %v127_v39 = vsel %vm96_vm0, %v816_v35, -inf  ;;  %v130_v40 = vsel %vm96_vm0, %v818_v36, -inf  ;;  %s670_s9 = sshll.u32 %s707_s0, 4  ;;  %s671_s9 = int_to_ptr.vmem [resolvable:$true] %s670_s9 }
   0xd   :  { %110 = vmax.xlane.f32.xlu0 %v109_v20  ;;  %113 = vmax.xlane.f32.xlu1 %v112_v21  ;;  %18 = vst.msk [vmem:[#allocation2 + $0x20] sm:$0xff] %vm13_vm11, %v705_v30  ;;  %19 = vst.msk [vmem:[#allocation2 + $0x28] sm:$0xff] %vm13_vm11, %v705_v30  ;;  %v830_v41 = vsel %vm74_vm14, inf, %v58_v31  ;;  %v832_v42 = vsel %vm75_vm15, inf, %v59_v32  ;;  %vm76_vm1 = vcmp.ne.f32.partialorder %v60_v37, %v60_v37  ;;  %v94_v49 = vlaneseq  ;;  %s683_s10 = scalar_lea.vmem %s671_s9, 16  ;;  %s687_s11 = scalar_lea.vmem %s671_s9, 32 }
   0xe   :  { %20 = vst.msk [vmem:[#allocation2 + $0x30] sm:$0xff] %vm13_vm11, %v705_v30  ;;  %21 = vst.msk [vmem:[#allocation2 + $0x38] sm:$0xff] %vm13_vm11, %v705_v30  ;;  %vm77_vm2 = vcmp.ne.f32.partialorder %v61_v38, %v61_v38  ;;  %v133_v43 = vsel %vm96_vm0, %v830_v41, -inf  ;;  %v136_v44 = vsel %vm96_vm0, %v832_v42, -inf  ;;  %v838_v45 = vsel %vm76_vm1, inf, %v60_v37  ;;  %p684_p0 = scmp.ne.s32.totalorder %s671_s9, %s683_s10  ;;  %p688_p1 = scmp.lt.s32.totalorder %s671_s9, %s671_s9 }
   0xf   :  { %22 = vst.msk [vmem:[#allocation2 + $0x40] sm:$0xff] %vm13_vm11, %v705_v30  ;;  %23 = vst.msk [vmem:[#allocation2 + $0x48] sm:$0xff] %vm13_vm11, %v705_v30  ;;  %v840_v46 = vsel %vm77_vm2, inf, %v61_v38  ;;  %v139_v47 = vsel %vm96_vm0, %v838_v45, -inf  ;;  %v850_v52 = vand.u32 127, %v94_v49  ;;  %p689_p2 = scmp.lt.s32.totalorder %s687_s11, %s683_s10 }
  0x10   :  { %24 = vst.msk [vmem:[#allocation2 + $0x50] sm:$0xff] %vm13_vm11, %v705_v30  ;;  %25 = vst.msk [vmem:[#allocation2 + $0x58] sm:$0xff] %vm13_vm11, %v705_v30  ;;  %v142_v48 = vsel %vm96_vm0, %v840_v46, -inf }
  0x11   :  { %26 = vst.msk [vmem:[#allocation2 + $0x60] sm:$0xff] %vm13_vm11, %v705_v30  ;;  %27 = vst.msk [vmem:[#allocation2 + $0x68] sm:$0xff] %vm13_vm11, %v705_v30  ;;  %116 = vmax.xlane.f32.xlu0 %v115_v26  ;;  %119 = vmax.xlane.f32.xlu1 %v118_v27  ;;  %p690_p3 = por %p689_p2, %p688_p1 }
  0x12   :  { %28 = vst.msk [vmem:[#allocation2 + $0x70] sm:$0xff] %vm13_vm11, %v705_v30  ;;  %29 = vst.msk [vmem:[#allocation2 + $0x78] sm:$0xff] %vm13_vm11, %v705_v30  ;;  %v846_v50 = vld [vmem:[#allocation2] sm:$0xff]  ;;  %v874_v57 = vld [vmem:[#allocation2 + $0x8] sm:$0xff] }
  0x13   :  { %v848_v51 = vld [vmem:[#allocation2 + $0x10] sm:$0xff]  ;;  %v876_v58 = vld [vmem:[#allocation2 + $0x18] sm:$0xff]  ;;  %p691_p4 = pnand %p690_p3, %p684_p0 }
  0x15   :  { %122 = vmax.xlane.f32.xlu0 %v121_v33  ;;  %125 = vmax.xlane.f32.xlu1 %v124_v34  ;;  %v954_v19 = vld [vmem:[#allocation2 + $0x30] sm:$0xff] }
  0x16   :  { %v1000_v37 = vld [vmem:[#allocation2 + $0x48] sm:$0xff] }
  0x19   :  { %128 = vmax.xlane.f32.xlu0 %v127_v39  ;;  %131 = vmax.xlane.f32.xlu1 %v130_v40 }
  0x1d   :  { %134 = vmax.xlane.f32.xlu0 %v133_v43  ;;  %137 = vmax.xlane.f32.xlu1 %v136_v44 }
  0x21   :  { %140 = vmax.xlane.f32.xlu0 %v139_v47  ;;  %143 = vmax.xlane.f32.xlu1 %v142_v48 }
  0x8e   :  { %v852_v53 = vpop.xlane.xlu0 %98  ;;  %v854_v54 = vpop.xlane.xlu1 %104 }
  0x8f   :  { %vm145_vm3 = vcmp.eq.f32.partialorder %v736_v6, %v852_v53  ;;  %vm451_vm4 = vcmp.gt.f32.partialorder %v852_v53, %v846_v50  ;;  %vm147_vm5 = vcmp.eq.f32.partialorder %v738_v7, %v854_v54  ;;  %vm453_vm6 = vcmp.gt.f32.partialorder %v854_v54, %v848_v51  ;;  %v914_v6 = vld [vmem:[#allocation2 + $0x20] sm:$0xff]  ;;  %v916_v7 = vld [vmem:[#allocation2 + $0x28] sm:$0xff] }
  0x90   :  { %v532_v55 = vsel %vm451_vm4, %v852_v53, %v846_v50  ;;  %v534_v56 = vsel %vm453_vm6, %v854_v54, %v848_v51  ;;  %v161_v59 = vsel %vm145_vm3, %v850_v52, 32  ;;  %v163_v60 = vsel %vm147_vm5, %v850_v52, 32 }
  0x91   :  { %548 = vst.msk [vmem:[#allocation2] sm:$0xff] %vm13_vm11, %v532_v55  ;;  %550 = vst.msk [vmem:[#allocation2 + $0x10] sm:$0xff] %vm13_vm11, %v534_v56  ;;  %v883_v61 = vsel %vm96_vm0, %v161_v59, 2147483647  ;;  %v886_v62 = vsel %vm96_vm0, %v163_v60, 2147483647 }
  0x92   :  { %v888_v63 = vpop.xlane.xlu0 %101  ;;  %v890_v0 = vpop.xlane.xlu1 %107  ;;  %v179_v1 = vshra.s32 %v883_v61, 16  ;;  %v209_v2 = vshra.s32 %v886_v62, 16  ;;  %v1042_v59 = vld [vmem:[#allocation2 + $0x50] sm:$0xff]  ;;  %v1044_v60 = vld [vmem:[#allocation2 + $0x58] sm:$0xff] }
  0x93   :  { %vm146_vm7 = vcmp.eq.f32.partialorder %v740_v8, %v888_v63  ;;  %vm452_vm8 = vcmp.gt.f32.partialorder %v888_v63, %v874_v57  ;;  %vm148_vm9 = vcmp.eq.f32.partialorder %v746_v11, %v890_v0  ;;  %vm454_vm10 = vcmp.gt.f32.partialorder %v890_v0, %v876_v58  ;;  %1396 = vst [vmem:[#allocation7_spill] sm:$0xff] %v1044_v60 }
  0x94   :  { %v533_v3 = vsel %vm452_vm8, %v888_v63, %v874_v57  ;;  %v535_v4 = vsel %vm454_vm10, %v890_v0, %v876_v58  ;;  %v912_v5 = vcvt.s32.f32 %v179_v1  ;;  %v162_v8 = vsel %vm146_vm7, %v850_v52, 32 }
  0x95   :  { %549 = vst.msk [vmem:[#allocation2 + $0x8] sm:$0xff] %vm13_vm11, %v533_v3  ;;  %551 = vst.msk [vmem:[#allocation2 + $0x18] sm:$0xff] %vm13_vm11, %v535_v4  ;;  %v164_v9 = vsel %vm148_vm9, %v850_v52, 32  ;;  %v927_v12 = vcvt.s32.f32 %v209_v2  ;;  %v930_v13 = vsel %vm96_vm0, %v162_v8, 2147483647 }
  0x96   :  { %182 = vmin.xlane.f32.xlu0 %v912_v5  ;;  %v923_v10 = vpop.xlane.xlu0 %110  ;;  %v925_v11 = vpop.xlane.xlu1 %113  ;;  %v933_v14 = vsel %vm96_vm0, %v164_v9, 2147483647  ;;  %v194_v18 = vshra.s32 %v930_v13, 16 }
  0x97   :  { %vm149_vm12 = vcmp.eq.f32.partialorder %v758_v16, %v923_v10  ;;  %vm455_vm13 = vcmp.gt.f32.partialorder %v923_v10, %v914_v6  ;;  %vm150_vm14 = vcmp.eq.f32.partialorder %v760_v17, %v925_v11  ;;  %vm456_vm15 = vcmp.gt.f32.partialorder %v925_v11, %v916_v7  ;;  %v956_v17 = vld [vmem:[#allocation2 + $0x38] sm:$0xff] }
  0x98   :  { %v536_v15 = vsel %vm455_vm13, %v923_v10, %v914_v6  ;;  %v537_v16 = vsel %vm456_vm15, %v925_v11, %v916_v7  ;;  %v224_v20 = vshra.s32 %v933_v14, 16  ;;  %v165_v21 = vsel %vm149_vm12, %v850_v52, 32 }
  0x99   :  { %552 = vst.msk [vmem:[#allocation2 + $0x20] sm:$0xff] %vm13_vm11, %v536_v15  ;;  %553 = vst.msk [vmem:[#allocation2 + $0x28] sm:$0xff] %vm13_vm11, %v537_v16  ;;  %v166_v24 = vsel %vm150_vm14, %v850_v52, 32  ;;  %v964_v25 = vcvt.s32.f32 %v194_v18  ;;  %v973_v31 = vsel %vm96_vm0, %v165_v21, 2147483647  ;;  %v1086_v21 = vld [vmem:[#allocation2 + $0x60] sm:$0xff] }
  0x9a   :  { %212 = vmin.xlane.f32.xlu0 %v927_v12  ;;  %v966_v26 = vpop.xlane.xlu0 %116  ;;  %v968_v27 = vpop.xlane.xlu1 %119  ;;  %v970_v30 = vcvt.s32.f32 %v224_v20  ;;  %v976_v32 = vsel %vm96_vm0, %v166_v24, 2147483647  ;;  %v239_v34 = vshra.s32 %v973_v31, 16  ;;  %1398 = vst [vmem:[#allocation9_spill] sm:$0xff] %v1086_v21  ;;  %v1088_v24 = vld [vmem:[#allocation2 + $0x68] sm:$0xff] }
  0x9b   :  { %vm151_vm1 = vcmp.eq.f32.partialorder %v772_v22, %v966_v26  ;;  %vm457_vm2 = vcmp.gt.f32.partialorder %v966_v26, %v954_v19  ;;  %vm152_vm3 = vcmp.eq.f32.partialorder %v774_v23, %v968_v27  ;;  %vm458_vm5 = vcmp.gt.f32.partialorder %v968_v27, %v956_v17  ;;  %197 = vmin.xlane.f32.xlu1 %v964_v25  ;;  %v998_v23 = vld [vmem:[#allocation2 + $0x40] sm:$0xff] }
  0x9c   :  { %v538_v33 = vsel %vm457_vm2, %v966_v26, %v954_v19  ;;  %v539_v22 = vsel %vm458_vm5, %v968_v27, %v956_v17  ;;  %v254_v38 = vshra.s32 %v976_v32, 16  ;;  %v167_v39 = vsel %vm151_vm1, %v850_v52, 32  ;;  %1399 = vst [vmem:[#allocation10_spill] sm:$0xff] %v1088_v24 }
  0x9d   :  { %554 = vst.msk [vmem:[#allocation2 + $0x30] sm:$0xff] %vm13_vm11, %v538_v33  ;;  %555 = vst.msk [vmem:[#allocation2 + $0x38] sm:$0xff] %vm13_vm11, %v539_v22  ;;  %v168_v40 = vsel %vm152_vm3, %v850_v52, 32  ;;  %v1007_v43 = vcvt.s32.f32 %v239_v34  ;;  %v1016_v49 = vsel %vm96_vm0, %v167_v39, 2147483647 }
  0x9e   :  { %v1009_v44 = vpop.xlane.xlu0 %122  ;;  %v1011_v47 = vpop.xlane.xlu1 %125  ;;  %v1013_v48 = vcvt.s32.f32 %v254_v38  ;;  %v1019_v55 = vsel %vm96_vm0, %v168_v40, 2147483647 }
  0x9f   :  { %vm153_vm7 = vcmp.eq.f32.partialorder %v786_v28, %v1009_v44  ;;  %vm459_vm9 = vcmp.gt.f32.partialorder %v1009_v44, %v998_v23  ;;  %vm154_vm12 = vcmp.eq.f32.partialorder %v788_v29, %v1011_v47  ;;  %vm460_vm14 = vcmp.gt.f32.partialorder %v1011_v47, %v1000_v37  ;;  %227 = vmin.xlane.f32.xlu1 %v970_v30 }
  0xa0   :  { %242 = vmin.xlane.f32.xlu0 %v1007_v43  ;;  %v540_v56 = vsel %vm459_vm9, %v1009_v44, %v998_v23  ;;  %v541_v28 = vsel %vm460_vm14, %v1011_v47, %v1000_v37  ;;  %v269_v29 = vshra.s32 %v1016_v49, 16  ;;  %v284_v1 = vshra.s32 %v1019_v55, 16 }
  0xa1   :  { %556 = vst.msk [vmem:[#allocation2 + $0x40] sm:$0xff] %vm13_vm11, %v540_v56  ;;  %557 = vst.msk [vmem:[#allocation2 + $0x48] sm:$0xff] %vm13_vm11, %v541_v28  ;;  %v169_v2 = vsel %vm153_vm7, %v850_v52, 32  ;;  %v170_v3 = vsel %vm154_vm12, %v850_v52, 32 }
  0xa2   :  { %v1051_v4 = vcvt.s32.f32 %v269_v29  ;;  %v1053_v8 = vpop.xlane.xlu0 %128  ;;  %v1055_v9 = vpop.xlane.xlu1 %131  ;;  %v1057_v15 = vcvt.s32.f32 %v284_v1  ;;  %v1060_v16 = vsel %vm96_vm0, %v169_v2, 2147483647  ;;  %v1063_v18 = vsel %vm96_vm0, %v170_v3, 2147483647  ;;  %v1130_v2 = vld [vmem:[#allocation2 + $0x70] sm:$0xff]  ;;  %v1132_v3 = vld [vmem:[#allocation2 + $0x78] sm:$0xff] }
  0xa3   :  { %1397 = vst [vmem:[#allocation8_spill] sm:$0xff] %v1055_v9  ;;  %vm155_vm1 = vcmp.eq.f32.partialorder %v816_v35, %v1053_v8  ;;  %vm1382_vm3 = vcmp.gt.f32.partialorder %v1053_v8, %v1042_v59  ;;  %vm156_vm7 = vcmp.eq.f32.partialorder %v818_v36, %v1055_v9  ;;  %vm1381_vm12 = vcmp.gt.f32.partialorder %v1055_v9, %v1044_v60 }
  0xa4   :  { %257 = vmin.xlane.f32.xlu1 %v1013_v48  ;;  %272 = vmin.xlane.f32.xlu0 %v1051_v4  ;;  %v542_v20 = vsel %vm1382_vm3, %v1053_v8, %v1042_v59  ;;  %v543_v35 = vsel %vm1381_vm12, %v1055_v9, %v1044_v60  ;;  %v299_v36 = vshra.s32 %v1060_v16, 16  ;;  %v314_v33 = vshra.s32 %v1063_v18, 16  ;;  %1402 = vst [vmem:[#allocation13_spill] sm:$0xff] %v1130_v2 }
  0xa5   :  { %558 = vst.msk [vmem:[#allocation2 + $0x50] sm:$0xff] %vm13_vm11, %v542_v20  ;;  %559 = vst.msk [vmem:[#allocation2 + $0x58] sm:$0xff] %vm13_vm11, %v543_v35  ;;  %v171_v22 = vsel %vm155_vm1, %v850_v52, 32  ;;  %v172_v34 = vsel %vm156_vm7, %v850_v52, 32 }
  0xa6   :  { %v1095_v38 = vcvt.s32.f32 %v299_v36  ;;  %v1097_v39 = vpop.xlane.xlu0 %134  ;;  %v1099_v40 = vpop.xlane.xlu1 %137  ;;  %v1101_v56 = vcvt.s32.f32 %v314_v33  ;;  %v1104_v28 = vsel %vm96_vm0, %v171_v22, 2147483647  ;;  %v1107_v29 = vsel %vm96_vm0, %v172_v34, 2147483647  ;;  %1403 = vst [vmem:[#allocation14_spill] sm:$0xff] %v1132_v3 }
  0xa7   :  { %1400 = vst [vmem:[#allocation11_spill] sm:$0xff] %v1097_v39  ;;  %1401 = vst [vmem:[#allocation12_spill] sm:$0xff] %v1099_v40  ;;  %vm157_vm12 = vcmp.eq.f32.partialorder %v830_v41, %v1097_v39  ;;  %vm1387_vm1 = vcmp.gt.f32.partialorder %v1097_v39, %v1086_v21  ;;  %vm158_vm7 = vcmp.eq.f32.partialorder %v832_v42, %v1099_v40  ;;  %v329_v42 = vshra.s32 %v1104_v28, 16 }
  0xa8   :  { %vm1386_vm3 = vcmp.gt.f32.partialorder %v1099_v40, %v1088_v24  ;;  %287 = vmin.xlane.f32.xlu1 %v1057_v15  ;;  %302 = vmin.xlane.f32.xlu0 %v1095_v38  ;;  %v544_v1 = vsel %vm1387_vm1, %v1097_v39, %v1086_v21  ;;  %v344_v20 = vshra.s32 %v1107_v29, 16  ;;  %v173_v35 = vsel %vm157_vm12, %v850_v52, 32 }
  0xa9   :  { %v545_v41 = vsel %vm1386_vm3, %v1099_v40, %v1088_v24  ;;  %560 = vst.msk [vmem:[#allocation2 + $0x60] sm:$0xff] %vm13_vm11, %v544_v1  ;;  %v174_v36 = vsel %vm158_vm7, %v850_v52, 32  ;;  %v1139_v33 = vcvt.s32.f32 %v329_v42  ;;  %v1148_v40 = vsel %vm96_vm0, %v173_v35, 2147483647 }
  0xaa   :  { %561 = vst.msk [vmem:[#allocation2 + $0x68] sm:$0xff] %vm13_vm11, %v545_v41  ;;  %v1141_v22 = vpop.xlane.xlu0 %140  ;;  %v1143_v34 = vpop.xlane.xlu1 %143  ;;  %v1145_v24 = vcvt.s32.f32 %v344_v20  ;;  %v1151_v21 = vsel %vm96_vm0, %v174_v36, 2147483647 }
  0xab   :  { %1404 = vst [vmem:[#allocation15_spill] sm:$0xff] %v1141_v22  ;;  %1405 = vst [vmem:[#allocation16_spill] sm:$0xff] %v1143_v34  ;;  %vm159_vm3 = vcmp.eq.f32.partialorder %v838_v45, %v1141_v22  ;;  %vm465_vm12 = vcmp.gt.f32.partialorder %v1141_v22, %v1130_v2  ;;  %vm160_vm7 = vcmp.eq.f32.partialorder %v840_v46, %v1143_v34  ;;  %v359_v46 = vshra.s32 %v1148_v40, 16 }
  0xac   :  { %vm1395_vm1 = vcmp.gt.f32.partialorder %v1143_v34, %v1132_v3  ;;  %317 = vmin.xlane.f32.xlu1 %v1101_v56  ;;  %332 = vmin.xlane.f32.xlu0 %v1139_v33  ;;  %v546_v1 = vsel %vm465_vm12, %v1141_v22, %v1130_v2  ;;  %v374_v41 = vshra.s32 %v1151_v21, 16  ;;  %v175_v42 = vsel %vm159_vm3, %v850_v52, 32 }
  0xad   :  { %v547_v45 = vsel %vm1395_vm1, %v1143_v34, %v1132_v3  ;;  %562 = vst.msk [vmem:[#allocation2 + $0x70] sm:$0xff] %vm13_vm11, %v546_v1  ;;  %v176_v20 = vsel %vm160_vm7, %v850_v52, 32  ;;  %v1179_v35 = vcvt.s32.f32 %v359_v46  ;;  %v1182_v36 = vsel %vm96_vm0, %v175_v42, 2147483647 }
  0xae   :  { %563 = vst.msk [vmem:[#allocation2 + $0x78] sm:$0xff] %vm13_vm11, %v547_v45  ;;  %v1185_v2 = vsel %vm96_vm0, %v176_v20, 2147483647  ;;  %v389_v3 = vshra.s32 %v1182_v36, 16  ;;  %v1190_v1 = vcvt.s32.f32 %v374_v41  ;;  %v178_v46 = vand.u32 65535, %v883_v61 }
  0xaf   :  { %v404_v45 = vshra.s32 %v1185_v2, 16  ;;  %v208_v41 = vand.u32 65535, %v886_v62  ;;  %v193_v22 = vand.u32 65535, %v930_v13  ;;  %v238_v62 = vand.u32 65535, %v973_v31 }
  0xb0   :  { %347 = vmin.xlane.f32.xlu1 %v1145_v24  ;;  %362 = vmin.xlane.f32.xlu0 %v1179_v35  ;;  %v1193_v34 = vcvt.s32.f32 %v389_v3  ;;  %v180_v20 = vcvt.s32.f32 %v178_v46  ;;  %v223_v46 = vand.u32 65535, %v933_v14  ;;  %v706_v31 = vmov 0  }
  0xb1   :  { %v1197_v52 = vcvt.s32.f32 %v404_v45  ;;  %v210_v45 = vcvt.s32.f32 %v208_v41  ;;  %v195_v61 = vcvt.s32.f32 %v193_v22  ;;  %v268_v22 = vand.u32 65535, %v1016_v49  ;;  %30 = vst.msk [vmem:[#allocation3] sm:$0xff] %vm13_vm11, %v706_v31  ;;  %31 = vst.msk [vmem:[#allocation3 + $0x8] sm:$0xff] %vm13_vm11, %v706_v31  ;;  %681 = vset.pattern.permute.xlu0 %v706_v31  ;;  %682 = vset.pattern.permute.xlu1 %v706_v31 }
  0xb2   :  { %v225_v41 = vcvt.s32.f32 %v223_v46  ;;  %32 = vst.msk [vmem:[#allocation3 + $0x10] sm:$0xff] %vm13_vm11, %v706_v31  ;;  %33 = vst.msk [vmem:[#allocation3 + $0x18] sm:$0xff] %vm13_vm11, %v706_v31 }
  0xb3   :  { %34 = vst.msk [vmem:[#allocation3 + $0x20] sm:$0xff] %vm13_vm11, %v706_v31  ;;  %35 = vst.msk [vmem:[#allocation3 + $0x28] sm:$0xff] %vm13_vm11, %v706_v31  ;;  %v270_v49 = vcvt.s32.f32 %v268_v22 }
  0xb4   :  { %377 = vmin.xlane.f32.xlu1 %v1190_v1  ;;  %392 = vmin.xlane.f32.xlu0 %v1193_v34  ;;  %36 = vst.msk [vmem:[#allocation3 + $0x30] sm:$0xff] %vm13_vm11, %v706_v31  ;;  %37 = vst.msk [vmem:[#allocation3 + $0x38] sm:$0xff] %vm13_vm11, %v706_v31 }
  0xb5   :  { %38 = vst.msk [vmem:[#allocation3 + $0x40] sm:$0xff] %vm13_vm11, %v706_v31  ;;  %39 = vst.msk [vmem:[#allocation3 + $0x48] sm:$0xff] %vm13_vm11, %v706_v31 }
  0xb6   :  { %40 = vst.msk [vmem:[#allocation3 + $0x50] sm:$0xff] %vm13_vm11, %v706_v31  ;;  %41 = vst.msk [vmem:[#allocation3 + $0x58] sm:$0xff] %vm13_vm11, %v706_v31 }
  0xb7   :  { %42 = vst.msk [vmem:[#allocation3 + $0x60] sm:$0xff] %vm13_vm11, %v706_v31  ;;  %43 = vst.msk [vmem:[#allocation3 + $0x68] sm:$0xff] %vm13_vm11, %v706_v31 }
  0xb8   :  { %407 = vmin.xlane.f32.xlu1 %v1197_v52  ;;  %44 = vst.msk [vmem:[#allocation3 + $0x70] sm:$0xff] %vm13_vm11, %v706_v31  ;;  %45 = vst.msk [vmem:[#allocation3 + $0x78] sm:$0xff] %vm13_vm11, %v706_v31 }
  0xb9   :  { %v470_v51 = vld [vmem:[#allocation3 + $0x18] sm:$0xff] }
  0xba   :  { %v471_v54 = vld [vmem:[#allocation3 + $0x20] sm:$0xff] }
 0x11f   :  { %v1201_v42 = vpop.xlane.xlu0 %182 }
 0x120   :  { %vm184_vm0 = vcmp.eq.f32.partialorder %v912_v5, %v1201_v42 }
 0x121   :  { %v185_v3 = vsel %vm184_vm0, %v180_v20, inf }
 0x122   :  { %186 = vmin.xlane.f32.xlu0 %v185_v3  ;;  %v253_v3 = vand.u32 65535, %v976_v32 }
 0x123   :  { %v1207_v39 = vpop.xlane.xlu0 %212 }
 0x124   :  { %vm214_vm3 = vcmp.eq.f32.partialorder %v927_v12, %v1207_v39  ;;  %v1211_v60 = vpop.xlane.xlu1 %197  ;;  %v240_v12 = vcvt.s32.f32 %v238_v62 }
 0x125   :  { %v215_v9 = vsel %vm214_vm3, %v210_v45, inf  ;;  %vm199_vm7 = vcmp.eq.f32.partialorder %v964_v25, %v1211_v60  ;;  %v298_v45 = vand.u32 65535, %v1060_v16  ;;  %v313_v16 = vand.u32 65535, %v1063_v18 }
 0x126   :  { %216 = vmin.xlane.f32.xlu0 %v215_v9  ;;  %v200_v5 = vsel %vm199_vm7, %v195_v61, inf  ;;  %v283_v9 = vand.u32 65535, %v1019_v55  ;;  %v343_v18 = vand.u32 65535, %v1107_v29  ;;  %v373_v29 = vand.u32 65535, %v1151_v21 }
 0x127   :  { %201 = vmin.xlane.f32.xlu1 %v200_v5  ;;  %v300_v55 = vcvt.s32.f32 %v298_v45  ;;  %v403_v21 = vand.u32 65535, %v1185_v2  ;;  %v189_v2 = vcvt.f32.s32 %v1201_v42 }
 0x128   :  { %v1217_v13 = vpop.xlane.xlu1 %227 }
 0x129   :  { %v1219_v20 = vpop.xlane.xlu0 %242  ;;  %vm229_vm0 = vcmp.eq.f32.partialorder %v970_v30, %v1217_v13 }
 0x12a   :  { %vm244_vm3 = vcmp.eq.f32.partialorder %v1007_v43, %v1219_v20  ;;  %v230_v14 = vsel %vm229_vm0, %v225_v41, inf  ;;  %v255_v43 = vcvt.s32.f32 %v253_v3  ;;  %v285_v41 = vcvt.s32.f32 %v283_v9 }
 0x12b   :  { %v245_v25 = vsel %vm244_vm3, %v240_v12, inf  ;;  %231 = vmin.xlane.f32.xlu1 %v230_v14  ;;  %v328_v12 = vand.u32 65535, %v1104_v28  ;;  %v315_v14 = vcvt.s32.f32 %v313_v16  ;;  %v358_v28 = vand.u32 65535, %v1148_v40 }
 0x12c   :  { %246 = vmin.xlane.f32.xlu0 %v245_v25  ;;  %v388_v40 = vand.u32 65535, %v1182_v36 }
 0x12d   :  { %v1243_v30 = vpop.xlane.xlu1 %257  ;;  %v1245_v32 = vpop.xlane.xlu0 %272  ;;  %v330_v25 = vcvt.s32.f32 %v328_v12  ;;  %v360_v9 = vcvt.s32.f32 %v358_v28 }
 0x12e   :  { %vm259_vm7 = vcmp.eq.f32.partialorder %v1013_v48, %v1243_v30  ;;  %vm274_vm0 = vcmp.eq.f32.partialorder %v1051_v4, %v1245_v32  ;;  %v264_v53 = vcvt.f32.s32 %v1243_v30 }
 0x12f   :  { %v260_v61 = vsel %vm259_vm7, %v255_v43, inf  ;;  %v275_v46 = vsel %vm274_vm0, %v270_v49, inf  ;;  %v345_v49 = vcvt.s32.f32 %v343_v18 }
 0x130   :  { %261 = vmin.xlane.f32.xlu1 %v260_v61  ;;  %276 = vmin.xlane.f32.xlu0 %v275_v46  ;;  %v375_v46 = vcvt.s32.f32 %v373_v29 }
 0x131   :  { %v1253_v62 = vpop.xlane.xlu1 %287  ;;  %v1255_v5 = vpop.xlane.xlu0 %302 }
 0x132   :  { %vm289_vm3 = vcmp.eq.f32.partialorder %v1057_v15, %v1253_v62  ;;  %vm304_vm1 = vcmp.eq.f32.partialorder %v1095_v38, %v1255_v5 }
 0x133   :  { %v290_v48 = vsel %vm289_vm3, %v285_v41, inf  ;;  %v305_v4 = vsel %vm304_vm1, %v300_v55, inf  ;;  %v390_v41 = vcvt.s32.f32 %v388_v40  ;;  %v405_v55 = vcvt.s32.f32 %v403_v21 }
 0x134   :  { %291 = vmin.xlane.f32.xlu1 %v290_v48  ;;  %306 = vmin.xlane.f32.xlu0 %v305_v4  ;;  %v190_v48 = vshll.u32 %v189_v2, 16  ;;  %v265_v2 = vshll.u32 %v264_v53, 16 }
 0x135   :  { %v1263_v3 = vpop.xlane.xlu1 %317  ;;  %v1265_v22 = vpop.xlane.xlu0 %332 }
 0x136   :  { %vm319_vm7 = vcmp.eq.f32.partialorder %v1101_v56, %v1263_v3  ;;  %vm334_vm0 = vcmp.eq.f32.partialorder %v1139_v33, %v1265_v22  ;;  %v339_v58 = vcvt.f32.s32 %v1265_v22 }
 0x137   :  { %v320_v15 = vsel %vm319_vm7, %v315_v14, inf  ;;  %v335_v38 = vsel %vm334_vm0, %v330_v25, inf  ;;  %v204_v14 = vcvt.f32.s32 %v1211_v60  ;;  %v468_v60 = vld [vmem:[#allocation3 + $0x8] sm:$0xff] }
 0x138   :  { %321 = vmin.xlane.f32.xlu1 %v320_v15  ;;  %336 = vmin.xlane.f32.xlu0 %v335_v38  ;;  %v234_v38 = vcvt.f32.s32 %v1217_v13  ;;  %v279_v13 = vcvt.f32.s32 %v1245_v32 }
 0x139   :  { %v1273_v31 = vpop.xlane.xlu1 %347  ;;  %v1275_v43 = vpop.xlane.xlu0 %362 }
 0x13a   :  { %vm349_vm1 = vcmp.eq.f32.partialorder %v1145_v24, %v1273_v31  ;;  %vm364_vm3 = vcmp.eq.f32.partialorder %v1179_v35, %v1275_v43  ;;  %v235_v50 = vshll.u32 %v234_v38, 16  ;;  %v280_v32 = vshll.u32 %v279_v13, 16 }
 0x13b   :  { %v350_v56 = vsel %vm349_vm1, %v345_v49, inf  ;;  %v365_v33 = vsel %vm364_vm3, %v360_v9, inf  ;;  %v469_v49 = vld [vmem:[#allocation3 + $0x10] sm:$0xff]  ;;  %v205_v9 = vshll.u32 %v204_v14, 16  ;;  %v354_v7 = vcvt.f32.s32 %v1273_v31  ;;  %v476_v31 = vld [vmem:[#allocation3 + $0x48] sm:$0xff] }
 0x13c   :  { %351 = vmin.xlane.f32.xlu1 %v350_v56  ;;  %366 = vmin.xlane.f32.xlu0 %v365_v33  ;;  %v369_v11 = vcvt.f32.s32 %v1275_v43 }
 0x13d   :  { %v1283_v45 = vpop.xlane.xlu1 %377  ;;  %v1285_v61 = vpop.xlane.xlu0 %392 }
 0x13e   :  { %vm379_vm7 = vcmp.eq.f32.partialorder %v1190_v1, %v1283_v45  ;;  %vm394_vm0 = vcmp.eq.f32.partialorder %v1193_v34, %v1285_v61  ;;  %v219_v1 = vcvt.f32.s32 %v1207_v39  ;;  %v467_v34 = vld [vmem:[#allocation3] sm:$0xff]  ;;  %v249_v39 = vcvt.f32.s32 %v1219_v20 }
 0x13f   :  { %v380_v24 = vsel %vm379_vm7, %v375_v46, inf  ;;  %v395_v35 = vsel %vm394_vm0, %v390_v41, inf  ;;  %v384_v17 = vcvt.f32.s32 %v1283_v45  ;;  %v399_v27 = vcvt.f32.s32 %v1285_v61  ;;  %v478_v45 = vld [vmem:[#allocation3 + $0x58] sm:$0xff] }
 0x140   :  { %381 = vmin.xlane.f32.xlu1 %v380_v24  ;;  %396 = vmin.xlane.f32.xlu0 %v395_v35  ;;  %v220_v28 = vshll.u32 %v219_v1, 16  ;;  %v250_v21 = vshll.u32 %v249_v39, 16  ;;  %v475_v39 = vld [vmem:[#allocation3 + $0x40] sm:$0xff] }
 0x141   :  { %v1292_v36 = vpop.xlane.xlu1 %407 }
 0x142   :  { %vm409_vm1 = vcmp.eq.f32.partialorder %v1197_v52, %v1292_v36  ;;  %v414_v37 = vcvt.f32.s32 %v1292_v36 }
 0x143   :  { %v410_v16 = vsel %vm409_vm1, %v405_v55, inf }
 0x144   :  { %411 = vmin.xlane.f32.xlu1 %v410_v16 }
 0x1ab   :  { %v187_v12 = vpop.xlane.xlu0 %186 }
 0x1ac   :  { %v188_v4 = vcvt.f32.s32 %v187_v12  ;;  %v294_v12 = vcvt.f32.s32 %v1253_v62  ;;  %v472_v62 = vld [vmem:[#allocation3 + $0x28] sm:$0xff] }
 0x1ae   :  { %v191_v25 = vadd.s32 %v190_v48, %v188_v4  ;;  %v309_v48 = vcvt.f32.s32 %v1255_v5 }
 0x1af   :  { %v217_v18 = vpop.xlane.xlu0 %216 }
 0x1b0   :  { %v483_v15 = vsel %vm451_vm4, %v191_v25, %v467_v34  ;;  %v218_v52 = vcvt.f32.s32 %v217_v18  ;;  %v202_v42 = vpop.xlane.xlu1 %201  ;;  %v473_v25 = vld [vmem:[#allocation3 + $0x30] sm:$0xff]  ;;  %vm1406_vm4 = vcmp.gt.f32.partialorder %v1053_v8, %v1042_v59  ;;  %v1408_v8 = vld [vmem:[#allocation7_spill] sm:$0xff] }
 0x1b1   :  { %500 = vst.msk [vmem:[#allocation3] sm:$0xff] %vm13_vm11, %v483_v15  ;;  %v203_v29 = vcvt.f32.s32 %v202_v42  ;;  %v310_v15 = vshll.u32 %v309_v48, 16  ;;  %v1407_v59 = vld [vmem:[#allocation8_spill] sm:$0xff] }
 0x1b2   :  { %v221_v40 = vadd.s32 %v220_v28, %v218_v52  ;;  %v295_v28 = vshll.u32 %v294_v12, 16  ;;  %v324_v52 = vcvt.f32.s32 %v1263_v3  ;;  %v474_v3 = vld [vmem:[#allocation3 + $0x38] sm:$0xff] }
 0x1b3   :  { %v206_v56 = vadd.s32 %v205_v9, %v203_v29 }
 0x1b4   :  { %v485_v33 = vsel %vm453_vm6, %v221_v40, %v469_v49  ;;  %v232_v46 = vpop.xlane.xlu1 %231  ;;  %v325_v40 = vshll.u32 %v324_v52, 16  ;;  %vm1409_vm6 = vcmp.gt.f32.partialorder %v1407_v59, %v1408_v8  ;;  %v1414_v52 = vld [vmem:[#allocation10_spill] sm:$0xff] }
 0x1b5   :  { %502 = vst.msk [vmem:[#allocation3 + $0x10] sm:$0xff] %vm13_vm11, %v485_v33  ;;  %v247_v41 = vpop.xlane.xlu0 %246  ;;  %v484_v20 = vsel %vm452_vm8, %v206_v56, %v468_v60  ;;  %v233_v24 = vcvt.f32.s32 %v232_v46  ;;  %v340_v60 = vshll.u32 %v339_v58, 16  ;;  %v477_v46 = vld [vmem:[#allocation3 + $0x50] sm:$0xff] }
 0x1b6   :  { %v248_v35 = vcvt.f32.s32 %v247_v41  ;;  %501 = vst.msk [vmem:[#allocation3 + $0x8] sm:$0xff] %vm13_vm11, %v484_v20  ;;  %v370_v20 = vshll.u32 %v369_v11, 16 }
 0x1b7   :  { %v236_v55 = vadd.s32 %v235_v50, %v233_v24 }
 0x1b8   :  { %v251_v16 = vadd.s32 %v250_v21, %v248_v35  ;;  %v567_v30 = vld [vmem:[#allocation3] sm:$0xff]  ;;  %v355_v21 = vshll.u32 %v354_v7, 16 }
 0x1b9   :  { %v262_v1 = vpop.xlane.xlu1 %261  ;;  %v277_v4 = vpop.xlane.xlu0 %276  ;;  %584 = vperm.xlu0 %681, %v567_v30   ;;  %v486_v57 = vsel %vm454_vm10, %v236_v55, %v470_v51 }
 0x1ba   :  { %v487_v63 = vsel %vm455_vm13, %v251_v16, %v471_v54  ;;  %v263_v34 = vcvt.f32.s32 %v262_v1  ;;  %v278_v14 = vcvt.f32.s32 %v277_v4  ;;  %503 = vst.msk [vmem:[#allocation3 + $0x18] sm:$0xff] %vm13_vm11, %v486_v57  ;;  %v479_v16 = vld [vmem:[#allocation3 + $0x60] sm:$0xff]  ;;  %v1411_v4 = vld [vmem:[#allocation9_spill] sm:$0xff] }
 0x1bb   :  { %504 = vst.msk [vmem:[#allocation3 + $0x20] sm:$0xff] %vm13_vm11, %v487_v63  ;;  %v1410_v1 = vld [vmem:[#allocation11_spill] sm:$0xff] }
 0x1bc   :  { %v266_v5 = vadd.s32 %v265_v2, %v263_v34  ;;  %v281_v18 = vadd.s32 %v280_v32, %v278_v14  ;;  %v569_v13 = vld [vmem:[#allocation3 + $0x10] sm:$0xff]  ;;  %v385_v2 = vshll.u32 %v384_v17, 16  ;;  %v400_v32 = vshll.u32 %v399_v27, 16 }
 0x1bd   :  { %v292_v0 = vpop.xlane.xlu1 %291  ;;  %v307_v38 = vpop.xlane.xlu0 %306  ;;  %v568_v9 = vld [vmem:[#allocation3 + $0x8] sm:$0xff]  ;;  %vm1412_vm8 = vcmp.gt.f32.partialorder %v1410_v1, %v1411_v4 }
 0x1be   :  { %v488_v6 = vsel %vm456_vm15, %v266_v5, %v472_v62  ;;  %v489_v10 = vsel %vm457_vm2, %v281_v18, %v473_v25  ;;  %v293_v42 = vcvt.f32.s32 %v292_v0  ;;  %v308_v49 = vcvt.f32.s32 %v307_v38  ;;  %587 = vperm.xlu1 %682, %v568_v9   ;;  %v480_v62 = vld [vmem:[#allocation3 + $0x68] sm:$0xff]  ;;  %v481_v25 = vld [vmem:[#allocation3 + $0x70] sm:$0xff]  ;;  %v482_v9 = vld [vmem:[#allocation3 + $0x78] sm:$0xff] }
 0x1bf   :  { %505 = vst.msk [vmem:[#allocation3 + $0x28] sm:$0xff] %vm13_vm11, %v488_v6  ;;  %506 = vst.msk [vmem:[#allocation3 + $0x30] sm:$0xff] %vm13_vm11, %v489_v10 }
 0x1c0   :  { %v296_v22 = vadd.s32 %v295_v28, %v293_v42  ;;  %v311_v29 = vadd.s32 %v310_v15, %v308_v49  ;;  %v415_v28 = vshll.u32 %v414_v37, 16  ;;  %v1413_v15 = vld [vmem:[#allocation12_spill] sm:$0xff] }
 0x1c1   :  { %v322_v19 = vpop.xlane.xlu1 %321  ;;  %v337_v26 = vpop.xlane.xlu0 %336  ;;  %v570_v55 = vld [vmem:[#allocation3 + $0x18] sm:$0xff]  ;;  %vm1415_vm10 = vcmp.gt.f32.partialorder %v1413_v15, %v1414_v52 }
 0x1c2   :  { %v490_v56 = vsel %vm458_vm5, %v296_v22, %v474_v3  ;;  %v491_v33 = vsel %vm459_vm9, %v311_v29, %v475_v39  ;;  %v323_v50 = vcvt.f32.s32 %v322_v19  ;;  %v338_v53 = vcvt.f32.s32 %v337_v26  ;;  %590 = vperm.xlu1 %682, %v569_v13   ;;  %v571_v14 = vld [vmem:[#allocation3 + $0x20] sm:$0xff]  ;;  %v1418_v39 = vld [vmem:[#allocation16_spill] sm:$0xff] }
 0x1c3   :  { %507 = vst.msk [vmem:[#allocation3 + $0x38] sm:$0xff] %vm13_vm11, %v490_v56  ;;  %508 = vst.msk [vmem:[#allocation3 + $0x40] sm:$0xff] %vm13_vm11, %v491_v33  ;;  %v1419_v22 = vld [vmem:[#allocation14_spill] sm:$0xff] }
 0x1c4   :  { %v326_v43 = vadd.s32 %v325_v40, %v323_v50  ;;  %v341_v41 = vadd.s32 %v340_v60, %v338_v53  ;;  %vm1420_vm13 = vcmp.gt.f32.partialorder %v1418_v39, %v1419_v22 }
 0x1c5   :  { %v352_v23 = vpop.xlane.xlu1 %351  ;;  %v367_v44 = vpop.xlane.xlu0 %366 }
 0x1c6   :  { %v492_v24 = vsel %vm460_vm14, %v326_v43, %v476_v31  ;;  %v493_v35 = vsel %vm1406_vm4, %v341_v41, %v477_v46  ;;  %v353_v51 = vcvt.f32.s32 %v352_v23  ;;  %v368_v54 = vcvt.f32.s32 %v367_v44  ;;  %593 = vperm.xlu1 %682, %v570_v55   ;;  %v572_v42 = vld [vmem:[#allocation3 + $0x28] sm:$0xff]  ;;  %v573_v40 = vld [vmem:[#allocation3 + $0x30] sm:$0xff] }
 0x1c7   :  { %509 = vst.msk [vmem:[#allocation3 + $0x48] sm:$0xff] %vm13_vm11, %v492_v24  ;;  %510 = vst.msk [vmem:[#allocation3 + $0x50] sm:$0xff] %vm13_vm11, %v493_v35 }
 0x1c8   :  { %v356_v61 = vadd.s32 %v355_v21, %v353_v51  ;;  %v371_v30 = vadd.s32 %v370_v20, %v368_v54 }
 0x1c9   :  { %v382_v47 = vpop.xlane.xlu1 %381  ;;  %v397_v12 = vpop.xlane.xlu0 %396 }
 0x1ca   :  { %v494_v48 = vsel %vm1409_vm6, %v356_v61, %v478_v45  ;;  %v495_v57 = vsel %vm1412_vm8, %v371_v30, %v479_v16  ;;  %v383_v63 = vcvt.f32.s32 %v382_v47  ;;  %v398_v34 = vcvt.f32.s32 %v397_v12  ;;  %596 = vperm.xlu1 %682, %v571_v14   ;;  %v574_v7 = vld [vmem:[#allocation3 + $0x38] sm:$0xff]  ;;  %v575_v19 = vld [vmem:[#allocation3 + $0x40] sm:$0xff] }
 0x1cb   :  { %511 = vst.msk [vmem:[#allocation3 + $0x58] sm:$0xff] %vm13_vm11, %v494_v48  ;;  %512 = vst.msk [vmem:[#allocation3 + $0x60] sm:$0xff] %vm13_vm11, %v495_v57 }
 0x1cc   :  { %v386_v36 = vadd.s32 %v385_v2, %v383_v63  ;;  %v401_v5 = vadd.s32 %v400_v32, %v398_v34 }
 0x1cd   :  { %v412_v18 = vpop.xlane.xlu1 %411 }
 0x1ce   :  { %v496_v58 = vsel %vm1415_vm10, %v386_v36, %v480_v62  ;;  %v497_v6 = vsel %vm465_vm12, %v401_v5, %v481_v25  ;;  %v413_v10 = vcvt.f32.s32 %v412_v18  ;;  %v576_v49 = vld [vmem:[#allocation3 + $0x48] sm:$0xff]  ;;  %599 = vperm.xlu1 %682, %v572_v42   ;;  %v577_v56 = vld [vmem:[#allocation3 + $0x50] sm:$0xff] }
 0x1cf   :  { %513 = vst.msk [vmem:[#allocation3 + $0x68] sm:$0xff] %vm13_vm11, %v496_v58  ;;  %514 = vst.msk [vmem:[#allocation3 + $0x70] sm:$0xff] %vm13_vm11, %v497_v6  ;;  %611 = vperm.xlu0 %681, %v576_v49  }
 0x1d0   :  { %v416_v3 = vadd.s32 %v415_v28, %v413_v10 }
 0x1d2   :  { %v498_v29 = vsel %vm1420_vm13, %v416_v3, %v482_v9  ;;  %v578_v60 = vld [vmem:[#allocation3 + $0x58] sm:$0xff]  ;;  %602 = vperm.xlu1 %682, %v573_v40   ;;  %v579_v33 = vld [vmem:[#allocation3 + $0x60] sm:$0xff] }
 0x1d3   :  { %515 = vst.msk [vmem:[#allocation3 + $0x78] sm:$0xff] %vm13_vm11, %v498_v29  ;;  %617 = vperm.xlu0 %681, %v578_v60  }
 0x1d6   :  { %v580_v11 = vld [vmem:[#allocation3 + $0x68] sm:$0xff]  ;;  %605 = vperm.xlu1 %682, %v574_v7   ;;  %v581_v50 = vld [vmem:[#allocation3 + $0x70] sm:$0xff] }
 0x1d7   :  { %623 = vperm.xlu0 %681, %v580_v11  }
 0x1da   :  { %v582_v26 = vld [vmem:[#allocation3 + $0x78] sm:$0xff]  ;;  %608 = vperm.xlu1 %682, %v575_v19  }
 0x1db   :  { %629 = vperm.xlu0 %681, %v582_v26  }
 0x1de   :  { %614 = vperm.xlu1 %682, %v577_v56  }
 0x1e2   :  { %620 = vperm.xlu1 %682, %v579_v33  }
 0x1e6   :  { %626 = vperm.xlu1 %682, %v581_v50  }
 0x234   :  { %v585_v53 = vpop.permute.xlu0 %584 }
 0x235   :  { %631 = vxpose.xlu1.b32.start [1/16] (narrow) %v585_v53, 8 }
 0x239   :  { %v588_v13 = vpop.permute.xlu1 %587 }
 0x23a   :  { %632 = vxpose.xlu1.b32.cont [2/16] (narrow) %v588_v13, 8 }
 0x23d   :  { %v591_v31 = vpop.permute.xlu1 %590 }
 0x23e   :  { %633 = vxpose.xlu1.b32.cont [3/16] (narrow) %v591_v31, 8 }
 0x241   :  { %v594_v46 = vpop.permute.xlu1 %593 }
 0x242   :  { %634 = vxpose.xlu1.b32.cont [4/16] (narrow) %v594_v46, 8 }
 0x245   :  { %v597_v43 = vpop.permute.xlu1 %596 }
 0x246   :  { %635 = vxpose.xlu1.b32.cont [5/16] (narrow) %v597_v43, 8 }
 0x249   :  { %v600_v41 = vpop.permute.xlu1 %599 }
 0x24a   :  { %636 = vxpose.xlu1.b32.cont [6/16] (narrow) %v600_v41, 8  ;;  %v612_v27 = vpop.permute.xlu0 %611 }
 0x24d   :  { %v603_v21 = vpop.permute.xlu1 %602 }
 0x24e   :  { %637 = vxpose.xlu1.b32.cont [7/16] (narrow) %v603_v21, 8  ;;  %v618_v44 = vpop.permute.xlu0 %617 }
 0x251   :  { %v606_v20 = vpop.permute.xlu1 %605 }
 0x252   :  { %638 = vxpose.xlu1.b32.cont [8/16] (narrow) %v606_v20, 8  ;;  %v624_v35 = vpop.permute.xlu0 %623 }
 0x255   :  { %v609_v17 = vpop.permute.xlu1 %608 }
 0x256   :  { %639 = vxpose.xlu1.b32.cont [9/16] (narrow) %v609_v17, 8  ;;  %v630_v54 = vpop.permute.xlu0 %629 }
 0x259   :  { %v615_v23 = vpop.permute.xlu1 %614 }
 0x25a   :  { %640 = vxpose.xlu1.b32.cont [10/16] (narrow) %v612_v27, 8 }
 0x25d   :  { %v621_v24 = vpop.permute.xlu1 %620 }
 0x25e   :  { %641 = vxpose.xlu1.b32.cont [11/16] (narrow) %v615_v23, 8 }
 0x261   :  { %v627_v51 = vpop.permute.xlu1 %626 }
 0x262   :  { %642 = vxpose.xlu1.b32.cont [12/16] (narrow) %v618_v44, 8 }
 0x266   :  { %643 = vxpose.xlu1.b32.cont [13/16] (narrow) %v621_v24, 8 }
 0x26a   :  { %644 = vxpose.xlu1.b32.cont [14/16] (narrow) %v624_v35, 8 }
 0x26e   :  { %645 = vxpose.xlu1.b32.cont [15/16] (narrow) %v627_v51, 8 }
 0x272   :  { %646 = vxpose.xlu1.b32.end [16/16] (narrow) %v630_v54, 8 }
 0x2b2   :  { %v647_v55 = vpop.trf.xlu1 }
 0x2b3   :  { %663 = vst [vmem:[#allocation4] sm:$0x1] %v647_v55 }
 0x2b4   :  { %694 = shalt.err (!%p691_p4)
}
 0x2b5   :  { %673 = dma.vmem_to_hbm [thread:$0]  %s671_s9, 16, %s1380_s1, [#allocation5]  }
 0x2b6   :  { %703 = dma.done.wait [#allocation5], 16  }
 0x2b7   :  { %704 = vsyncadd [#allocation5], 4294967280 }
 0x2b8   :  { %677 = vsyncpa [#allocation5], 1 }

</bundles_post_ra>
